<compile_context>
chip_gen: v7x
topology: tpu7x:2x2x1
jax: 0.10.0
libtpu: 0.0.40
codegen_flags: <defaults>
</compile_context>

<pallas_src>
import math

import jax
import jax.numpy as jnp
from jax.experimental import pallas as pl
from jax.experimental.pallas import tpu as pltpu

TOP_N = 3
LANES = 128


def _make_top3_idx_kernel(bt: int, rows: int, lanes: int, n_valid: int, needs_mask: bool):
    """Kernel: for each of `bt` batch rows, write the TOP_N flat argmax indices of |diff|."""

    def kernel(diff_ref, idx_ref):
        # Hoisted index arrays (shared by all bt batch rows in this block).
        row_i = jax.lax.broadcasted_iota(jnp.int32, (rows, lanes), 0)
        lane_i = jax.lax.broadcasted_iota(jnp.int32, (rows, lanes), 1)
        flat_idx = row_i * lanes + lane_i
        lane1 = jax.lax.broadcasted_iota(jnp.int32, (1, lanes), 1)
        neg_inf = jnp.float32(-jnp.inf)
        if needs_mask:
            valid = flat_idx < n_valid  # mask out lane padding (only built when padded)

        for j in range(bt):  # static unroll, bt is small (<= 8)
            d = jnp.abs(diff_ref[j].astype(jnp.float32))  # (rows, lanes)
            work = jnp.where(valid, d, neg_inf) if needs_mask else d

            picks = []
            for t in range(TOP_N):
                m = jnp.max(work)
                # first (lowest flat index) occurrence on exact ties
                sel = jnp.min(jnp.where(work == m, flat_idx, 1 << 30))
                picks.append(sel)
                if t + 1 < TOP_N:  # no invalidation needed after the last pick
                    work = jnp.where(flat_idx == sel, neg_inf, work)

            # lanes 0..2 hold the three indices; remaining lanes are don't-care filler.
            idx_ref[j] = jnp.where(lane1 == 0, picks[0],
                                   jnp.where(lane1 == 1, picks[1], picks[2]))

    return kernel


def _max3_update_impl(difference: jax.Array, weight: jax.Array) -> jax.Array:
    """weight + per-batch top-3 mask of |difference| (top-3 search done in Pallas)."""
    assert difference.shape == weight.shape
    orig_shape = difference.shape
    b = orig_shape[0]
    n = math.prod(orig_shape[1:])
    assert n >= TOP_N, "need at least TOP_N elements per batch (torch.topk would error too)"
    assert n < (1 << 30), "int32 flat-index encoding assumes < 2^30 elements per batch"

    rows = pl.cdiv(n, LANES)
    npad = rows * LANES
    needs_mask = npad != n

    d = difference.reshape(b, n)
    if needs_mask:
        d = jnp.pad(d, ((0, 0), (0, npad - n)))
    d = d.reshape(b, rows, LANES)

    # --- choose how many batch elements per grid step ---------------------------------
    slab_bytes = rows * LANES * d.dtype.itemsize
    bt = max(1, min(b, pl.cdiv(512 * 1024, slab_bytes)))        # amortize per-step overhead
    bt = min(bt, 8)                                             # bound static unroll
    bt = min(bt, max(1, (8 * 1024 * 1024) // (2 * slab_bytes))) # keep DMA buffers small
    if b >= 2:
        bt = min(bt, b // 2)  # keep >= 2 grid steps so megacore can shard the batch axis
    bt = max(1, bt)
    while b % bt:
        bt -= 1
    grid = (b // bt,)

    # --- compiler params ---------------------------------------------------------------
    cp_kwargs = {"dimension_semantics": ("parallel",)}
    vmem_est = 2 * bt * slab_bytes + 4 * rows * LANES * 4 + (1 << 20)
    if vmem_est > 12 * 1024 * 1024:
        cp_kwargs["vmem_limit_bytes"] = int(min(vmem_est, 48 * 1024 * 1024))
    # TODO(synk): for per-batch slabs larger than VMEM, add an inner rows-tiling grid axis
    # (marked "arbitrary") with a running top-3 merge kept in scratch across tiles.

    idx_out = pl.pallas_call(
        _make_top3_idx_kernel(bt, rows, LANES, n, needs_mask),
        out_shape=jax.ShapeDtypeStruct((b, 1, LANES), jnp.int32),
        grid=grid,
        in_specs=[pl.BlockSpec((bt, rows, LANES), lambda i: (i, 0, 0))],
        out_specs=pl.BlockSpec((bt, 1, LANES), lambda i: (i, 0, 0)),
        compiler_params=pltpu.CompilerParams(**cp_kwargs),
    )(d)

    # Apply the update as 3 scalar scatter-adds per batch (indices are distinct, so this
    # is exactly equivalent to "set mask = 1 at top-3 positions, then add").
    top_idx = idx_out[:, 0, :TOP_N]                      # (B, TOP_N) int32 flat indices
    b_ids = jnp.arange(b, dtype=top_idx.dtype)[:, None]  # (B, 1)
    new_w = weight.reshape(b, n).at[b_ids, top_idx].add(1.0, unique_indices=True)
    return new_w.reshape(orig_shape)


max3_update = jax.jit(_max3_update_impl)


class Max3:
    """Max residue — JAX/Pallas port of the PyTorch module."""

    def __init__(self, weight: jax.Array):
        self.weight = weight

    def forward(self, difference: jax.Array, epoch=None):
        # The original `torch.allclose(...)` result is computed but unused; skipped.
        if 1000 < epoch < 18000 and epoch % 200 == 0:
            self.weight = max3_update(difference, self.weight)
            return self.weight
        else:
            return self.weight

    __call__ = forward


def _reference(difference, weight):
    """Pure-JAX reference using lax.top_k for verification."""
    b = difference.shape[0]
    flat = jnp.abs(difference.reshape(b, -1))
    _, idxs = jax.lax.top_k(flat, TOP_N)  # (B, 3)
    add = jnp.zeros_like(flat)
    add = jax.vmap(lambda a, i: a.at[i].set(1.0))(add, idxs)
    return weight + add.reshape(difference.shape)


if __name__ == "__main__":
    key = jax.random.PRNGKey(0)

    # Case 1: lane-aligned shape (no padding path), matches the NCHW use case.
    B, C, H, W = 2, 4, 16, 16
    difference = jax.random.normal(key, (B, C, H, W), dtype=jnp.float32)
    weight0 = jnp.zeros((B, C, H, W), dtype=jnp.float32)

    mod = Max3(weight0)
    out_update = jax.block_until_ready(mod(difference, epoch=1200))  # update epoch
    out_same = jax.block_until_ready(mod(difference, epoch=1201))    # non-update epoch

    ref = _reference(difference, weight0)
    assert out_update.shape == (B, C, H, W)
    assert jnp.allclose(out_update, ref), "mismatch vs pure-JAX top-k reference"
    assert jnp.allclose(out_same, out_update), "non-update epoch must return stored weight"
    assert float(jnp.sum(out_update)) == float(B * TOP_N)

    # Case 2: non-lane-aligned shape to exercise the padding/valid-mask path.
    d2 = jax.random.normal(jax.random.PRNGKey(1), (2, 3, 5, 7), dtype=jnp.float32)
    w2 = jnp.zeros_like(d2)
    out2 = jax.block_until_ready(max3_update(d2, w2))
    ref2 = _reference(d2, w2)
    assert jnp.allclose(out2, ref2), "mismatch on padded shape"
    assert float(jnp.sum(out2)) == float(2 * TOP_N)

    print("KERNEL_OK")
</pallas_src>

<mosaic_0001>
module attributes {stable_mosaic.version = 11 : i64} {
  func.func @kernel(%arg0: i32, %arg1: memref<1x8x128xf32, #tpu.memory_space<vmem>>, %arg2: memref<1x1x128xi32, #tpu.memory_space<vmem>>) attributes {dimension_semantics = [#tpu.dimension_semantics<parallel>], iteration_bounds = array<i64: 2>, scalar_prefetch = 0 : i64, scratch_operands = 0 : i64, tpu.core_type = #tpu.core_type<tc>, window_params = [{transform_indices = @transform_0, window_bounds = array<i64: 1, 8, 128>}, {transform_indices = @transform_1, window_bounds = array<i64: 1, 1, 128>}]} {
    %0 = tpu.iota {dimensions = array<i32: 0>} : vector<8x128xi32>
    %1 = tpu.iota {dimensions = array<i32: 1>} : vector<8x128xi32>
    %c128_i32 = arith.constant 128 : i32
    %2 = vector.broadcast %c128_i32 : i32 to vector<8x128xi32>
    %3 = arith.muli %0, %2 : vector<8x128xi32>
    %4 = arith.addi %3, %1 : vector<8x128xi32>
    %5 = tpu.iota {dimensions = array<i32: 1>} : vector<1x128xi32>
    %c0 = arith.constant 0 : index
    %c0_0 = arith.constant 0 : index
    %c0_1 = arith.constant 0 : index
    %6 = vector.load %arg1[%c0, %c0_0, %c0_1] : memref<1x8x128xf32, #tpu.memory_space<vmem>>, vector<1x8x128xf32>
    %7 = vector.shape_cast %6 : vector<1x8x128xf32> to vector<8x128xf32>
    %8 = math.absf %7 : vector<8x128xf32>
    %9 = vector.shape_cast %8 : vector<8x128xf32> to vector<1x8x128xf32>
    %cst = arith.constant dense<0xFF800000> : vector<1xf32>
    %10 = vector.multi_reduction <maximumf>, %9, %cst [1, 2] : vector<1x8x128xf32> to vector<1xf32>
    %11 = vector.shape_cast %10 : vector<1xf32> to vector<1x1x1xf32>
    %12 = vector.extract %11[0, 0, 0] : f32 from vector<1x1x1xf32>
    %13 = vector.broadcast %12 : f32 to vector<8x128xf32>
    %14 = arith.cmpf oeq, %8, %13 : vector<8x128xf32>
    %c1073741824_i32 = arith.constant 1073741824 : i32
    %15 = vector.broadcast %c1073741824_i32 : i32 to vector<8x128xi32>
    %16 = arith.select %14, %4, %15 : vector<8x128xi1>, vector<8x128xi32>
    %17 = vector.shape_cast %16 : vector<8x128xi32> to vector<1x8x128xi32>
    %cst_2 = arith.constant dense<2147483647> : vector<1xi32>
    %18 = vector.multi_reduction <minsi>, %17, %cst_2 [1, 2] : vector<1x8x128xi32> to vector<1xi32>
    %19 = vector.shape_cast %18 : vector<1xi32> to vector<1x1x1xi32>
    %20 = vector.extract %19[0, 0, 0] : i32 from vector<1x1x1xi32>
    %21 = vector.broadcast %20 : i32 to vector<8x128xi32>
    %22 = arith.cmpi eq, %4, %21 : vector<8x128xi32>
    %cst_3 = arith.constant 0xFF800000 : f32
    %23 = vector.broadcast %cst_3 : f32 to vector<8x128xf32>
    %24 = arith.select %22, %23, %8 : vector<8x128xi1>, vector<8x128xf32>
    %25 = vector.shape_cast %24 : vector<8x128xf32> to vector<1x8x128xf32>
    %cst_4 = arith.constant dense<0xFF800000> : vector<1xf32>
    %26 = vector.multi_reduction <maximumf>, %25, %cst_4 [1, 2] : vector<1x8x128xf32> to vector<1xf32>
    %27 = vector.shape_cast %26 : vector<1xf32> to vector<1x1x1xf32>
    %28 = vector.extract %27[0, 0, 0] : f32 from vector<1x1x1xf32>
    %29 = vector.broadcast %28 : f32 to vector<8x128xf32>
    %30 = arith.cmpf oeq, %24, %29 : vector<8x128xf32>
    %c1073741824_i32_5 = arith.constant 1073741824 : i32
    %31 = vector.broadcast %c1073741824_i32_5 : i32 to vector<8x128xi32>
    %32 = arith.select %30, %4, %31 : vector<8x128xi1>, vector<8x128xi32>
    %33 = vector.shape_cast %32 : vector<8x128xi32> to vector<1x8x128xi32>
    %cst_6 = arith.constant dense<2147483647> : vector<1xi32>
    %34 = vector.multi_reduction <minsi>, %33, %cst_6 [1, 2] : vector<1x8x128xi32> to vector<1xi32>
    %35 = vector.shape_cast %34 : vector<1xi32> to vector<1x1x1xi32>
    %36 = vector.extract %35[0, 0, 0] : i32 from vector<1x1x1xi32>
    %37 = vector.broadcast %36 : i32 to vector<8x128xi32>
    %38 = arith.cmpi eq, %4, %37 : vector<8x128xi32>
    %cst_7 = arith.constant 0xFF800000 : f32
    %39 = vector.broadcast %cst_7 : f32 to vector<8x128xf32>
    %40 = arith.select %38, %39, %24 : vector<8x128xi1>, vector<8x128xf32>
    %41 = vector.shape_cast %40 : vector<8x128xf32> to vector<1x8x128xf32>
    %cst_8 = arith.constant dense<0xFF800000> : vector<1xf32>
    %42 = vector.multi_reduction <maximumf>, %41, %cst_8 [1, 2] : vector<1x8x128xf32> to vector<1xf32>
    %43 = vector.shape_cast %42 : vector<1xf32> to vector<1x1x1xf32>
    %44 = vector.extract %43[0, 0, 0] : f32 from vector<1x1x1xf32>
    %45 = vector.broadcast %44 : f32 to vector<8x128xf32>
    %46 = arith.cmpf oeq, %40, %45 : vector<8x128xf32>
    %c1073741824_i32_9 = arith.constant 1073741824 : i32
    %47 = vector.broadcast %c1073741824_i32_9 : i32 to vector<8x128xi32>
    %48 = arith.select %46, %4, %47 : vector<8x128xi1>, vector<8x128xi32>
    %49 = vector.shape_cast %48 : vector<8x128xi32> to vector<1x8x128xi32>
    %cst_10 = arith.constant dense<2147483647> : vector<1xi32>
    %50 = vector.multi_reduction <minsi>, %49, %cst_10 [1, 2] : vector<1x8x128xi32> to vector<1xi32>
    %51 = vector.shape_cast %50 : vector<1xi32> to vector<1x1x1xi32>
    %52 = vector.extract %51[0, 0, 0] : i32 from vector<1x1x1xi32>
    %c0_i32 = arith.constant 0 : i32
    %53 = vector.broadcast %c0_i32 : i32 to vector<1x128xi32>
    %54 = arith.cmpi eq, %5, %53 : vector<1x128xi32>
    %c1_i32 = arith.constant 1 : i32
    %55 = vector.broadcast %c1_i32 : i32 to vector<1x128xi32>
    %56 = arith.cmpi eq, %5, %55 : vector<1x128xi32>
    %57 = vector.broadcast %36 : i32 to vector<1x128xi32>
    %58 = vector.broadcast %52 : i32 to vector<1x128xi32>
    %59 = arith.select %56, %57, %58 : vector<1x128xi1>, vector<1x128xi32>
    %60 = vector.broadcast %20 : i32 to vector<1x128xi32>
    %61 = arith.select %54, %60, %59 : vector<1x128xi1>, vector<1x128xi32>
    %c0_11 = arith.constant 0 : index
    %c0_12 = arith.constant 0 : index
    %c0_13 = arith.constant 0 : index
    %62 = vector.load %arg2[%c0_11, %c0_12, %c0_13] : memref<1x1x128xi32, #tpu.memory_space<vmem>>, vector<1x1x128xi32>
    %63 = vector.shape_cast %62 : vector<1x1x128xi32> to vector<1x128xi32>
    %64 = vector.shape_cast %61 : vector<1x128xi32> to vector<1x1x128xi32>
    tpu.vector_store %arg2[%c0_11, %c0_12, %c0_13], %64 {strides = array<i32>} : memref<1x1x128xi32, #tpu.memory_space<vmem>>, vector<1x1x128xi32>,
    return
  }
  func.func @transform_0(%arg0: i32) -> (i32, i32, i32) {
    %c0_i32 = arith.constant 0 : i32
    %c0_i32_0 = arith.constant 0 : i32
    %c0_i32_1 = arith.constant 0 : i32
    return %arg0, %c0_i32, %c0_i32_0 : i32, i32, i32
  }
  func.func @transform_1(%arg0: i32) -> (i32, i32, i32) {
    %c0_i32 = arith.constant 0 : i32
    %c0_i32_0 = arith.constant 0 : i32
    %c0_i32_1 = arith.constant 0 : i32
    return %arg0, %c0_i32, %c0_i32_0 : i32, i32, i32
  }
}

</mosaic_0001>

<bundles_post_ra>
// kernel: _max3_update_impl.1
= control target key start
LH: loop header
LB: loop body
LE: loop exit
PB: predicated region body
PF: predicated region fallthrough
CT: control target
= control target key end

     0   :  { %s331_s6 = smov 0   ;;  %s374_s0 = inlined_call_operand.vmem [shape: f32[2,8,128], index: 0, kind: input, shape index: {}]   ;;  %s375_s1 = inlined_call_operand.vmem [shape: s32[2,1,128], index: 1, kind: output, shape index: {}]  }
   0x1 LB: > { %s285_s7 = sadd.s32 4294967295, %s319_s6   ;;  %p289_p0 = scmp.ge.s32.totalorder %s319_s6, 1  ;;  %s319_s6 = sphi %s331_s6, %s11_s6  }
   0x2   : > { %p86_p1 = scmp.lt.s32.totalorder %s319_s6, 3 }
   0x4   : > { %p87_p2 = pnand %p289_p0, %p86_p1 }
   0x5   : > { %p103_p3 = scmp.lt.s32.totalorder (!%p87_p2), %s285_s7, 1  ;;  %v110_v9 = vlaneseq (!%p87_p2) }
   0x6   : > { %90 = sbr.rel (%p87_p2) target bundleno = 1718 (0x6b6), region = 24 }
   0x7   : > { %v111_v10 = vshrl.u32 (!%p87_p2), %v110_v9, 7  ;;  %v345_v11 = vand.u32 (!%p87_p2), 127, %v110_v9 }
   0x9   : > { %v114_v12 = vmul.u32 (!%p87_p2), 128, %v111_v10 }
   0xb   : > { %v348_v13 = vadd.s32 (!%p87_p2), %v114_v12, %v345_v11 }
   0xd   : > { %s377_s7 = smov (!%p103_p3, %s285_s7), 1 }
   0xe   : > { %s290_s8 = sshll.u32 %s377_s7, 3  ;;  %s109_s20 = scalar_lea.vmem %s375_s1, %s377_s7 }
   0xf   : > { %s106_s11 = scalar_lea.vmem %s374_s0, %s290_s8 }
  0x10   : > { %v116_v0 = vld [vmem:[%s106_s11] sm:$0xff] }
  0x11   : > { %v117_v1 = vand.u32 2147483647, %v116_v0 }
  0x13   : > { %118 = vmax.xlane.f32.xlu0 %v117_v1 }
  0xa0   : > { %v119_v2 = vpop.xlane.xlu0 %118 }
  0xa1   : > { %v120_v3 = vrot.slane %v119_v2, 4 }
  0xa3   : > { %v121_v4 = vmax.f32 %v119_v2, %v120_v3 }
  0xa5   : > { %v122_v5 = vrot.slane %v121_v4, 2 }
  0xa7   : > { %v123_v6 = vmax.f32 %v121_v4, %v122_v5 }
  0xa9   : > { %v124_v7 = vrot.slane %v123_v6, 1 }
  0xab   : > { %v125_v8 = vmax.f32 %v123_v6, %v124_v7 }
  0xad   : > { %293 = vpush %v125_v8 }
  0xde   : > { %s294_s12 = spop %293 }
  0xdf   : > { %v127_v14 = vstv %s294_s12 }
  0xe0   : > { %vm128_vm0 = vcmp.eq.f32.partialorder %v117_v1, %v127_v14 }
  0xe1   : > { %v129_v15 = vsel %vm128_vm0, %v348_v13, 1073741824 }
  0xe2   : > { %v131_v16 = vshra.s32 %v129_v15, 16  ;;  %v130_v18 = vand.u32 65535, %v129_v15 }
  0xe4   : > { %v133_v17 = vcvt.s32.f32 %v131_v16  ;;  %v132_v20 = vcvt.s32.f32 %v130_v18 }
  0xe6   : > { %134 = vmin.xlane.f32.xlu0 %v133_v17 }
 0x173   : > { %v135_v19 = vpop.xlane.xlu0 %134 }
 0x174   : > { %vm136_vm1 = vcmp.eq.f32.partialorder %v133_v17, %v135_v19  ;;  %v141_v22 = vcvt.f32.s32 %v135_v19 }
 0x175   : > { %v137_v21 = vsel %vm136_vm1, %v132_v20, inf  ;;  %vm233_vm1 = vcmp.eq.s32.totalorder %v345_v11, 1 }
 0x176   : > { %138 = vmin.xlane.f32.xlu1 %v137_v21  ;;  %v142_v24 = vshll.u32 %v141_v22, 16 }
 0x203   : > { %v139_v23 = vpop.xlane.xlu1 %138 }
 0x204   : > { %v140_v25 = vcvt.f32.s32 %v139_v23 }
 0x206   : > { %v143_v26 = vadd.s32 %v142_v24, %v140_v25 }
 0x208   : > { %v144_v27 = vrot.slane %v143_v26, 4 }
 0x20a   : > { %vm145_vm2 = vcmp.lt.s32.totalorder %v143_v26, %v144_v27 }
 0x20b   : > { %v146_v28 = vsel %vm145_vm2, %v143_v26, %v144_v27  ;;  %vm232_vm2 = vcmp.eq.s32.totalorder %v345_v11, 0 }
 0x20c   : > { %v147_v29 = vrot.slane %v146_v28, 2 }
 0x20e   : > { %vm148_vm3 = vcmp.lt.s32.totalorder %v146_v28, %v147_v29 }
 0x20f   : > { %v149_v30 = vsel %vm148_vm3, %v146_v28, %v147_v29 }
 0x210   : > { %v150_v31 = vrot.slane %v149_v30, 1 }
 0x212   : > { %vm151_vm4 = vcmp.lt.s32.totalorder %v149_v30, %v150_v31 }
 0x213   : > { %v152_v32 = vsel %vm151_vm4, %v149_v30, %v150_v31 }
 0x214   : > { %295 = vpush %v152_v32 }
 0x245   : > { %s351_s13 = spop %295 }
 0x246   : > { %v154_v33 = vstv %s351_s13 }
 0x247   : > { %vm155_vm5 = vcmp.eq.s32.totalorder %v348_v13, %v154_v33 }
 0x248   : > { %v156_v34 = vsel %vm155_vm5, -inf, %v117_v1 }
 0x249   : > { %157 = vmax.xlane.f32.xlu1 %v156_v34 }
 0x2d6   : > { %v158_v35 = vpop.xlane.xlu1 %157 }
 0x2d7   : > { %v159_v36 = vrot.slane %v158_v35, 4 }
 0x2d9   : > { %v160_v37 = vmax.f32 %v158_v35, %v159_v36 }
 0x2db   : > { %v161_v38 = vrot.slane %v160_v37, 2 }
 0x2dd   : > { %v162_v39 = vmax.f32 %v160_v37, %v161_v38 }
 0x2df   : > { %v163_v40 = vrot.slane %v162_v39, 1 }
 0x2e1   : > { %v164_v41 = vmax.f32 %v162_v39, %v163_v40 }
 0x2e3   : > { %297 = vpush %v164_v41 }
 0x314   : > { %s298_s14 = spop %297 }
 0x315   : > { %v166_v42 = vstv %s298_s14 }
 0x316   : > { %vm167_vm6 = vcmp.eq.f32.partialorder %v156_v34, %v166_v42 }
 0x317   : > { %v168_v43 = vsel %vm167_vm6, %v348_v13, 1073741824 }
 0x318   : > { %v170_v44 = vshra.s32 %v168_v43, 16  ;;  %v169_v46 = vand.u32 65535, %v168_v43 }
 0x31a   : > { %v172_v45 = vcvt.s32.f32 %v170_v44  ;;  %v171_v48 = vcvt.s32.f32 %v169_v46 }
 0x31c   : > { %173 = vmin.xlane.f32.xlu0 %v172_v45 }
 0x3a9   : > { %v174_v47 = vpop.xlane.xlu0 %173 }
 0x3aa   : > { %vm175_vm7 = vcmp.eq.f32.partialorder %v172_v45, %v174_v47  ;;  %v180_v50 = vcvt.f32.s32 %v174_v47 }
 0x3ab   : > { %v176_v49 = vsel %vm175_vm7, %v171_v48, inf }
 0x3ac   : > { %177 = vmin.xlane.f32.xlu1 %v176_v49  ;;  %v181_v52 = vshll.u32 %v180_v50, 16 }
 0x439   : > { %v178_v51 = vpop.xlane.xlu1 %177 }
 0x43a   : > { %v179_v53 = vcvt.f32.s32 %v178_v51 }
 0x43c   : > { %v182_v54 = vadd.s32 %v181_v52, %v179_v53 }
 0x43e   : > { %v183_v55 = vrot.slane %v182_v54, 4 }
 0x440   : > { %vm184_vm8 = vcmp.lt.s32.totalorder %v182_v54, %v183_v55 }
 0x441   : > { %v185_v56 = vsel %vm184_vm8, %v182_v54, %v183_v55 }
 0x442   : > { %v186_v57 = vrot.slane %v185_v56, 2 }
 0x444   : > { %vm187_vm9 = vcmp.lt.s32.totalorder %v185_v56, %v186_v57 }
 0x445   : > { %v188_v58 = vsel %vm187_vm9, %v185_v56, %v186_v57 }
 0x446   : > { %v189_v59 = vrot.slane %v188_v58, 1 }
 0x448   : > { %vm190_vm10 = vcmp.lt.s32.totalorder %v188_v58, %v189_v59 }
 0x449   : > { %v191_v60 = vsel %vm190_vm10, %v188_v58, %v189_v59 }
 0x44a   : > { %299 = vpush %v191_v60 }
 0x47b   : > { %s358_s15 = spop %299 }
 0x47c   : > { %v193_v61 = vstv %s358_s15 }
 0x47d   : > { %vm194_vm11 = vcmp.eq.s32.totalorder %v348_v13, %v193_v61 }
 0x47e   : > { %v195_v62 = vsel %vm194_vm11, -inf, %v156_v34 }
 0x47f   : > { %196 = vmax.xlane.f32.xlu0 %v195_v62 }
 0x50c   : > { %v197_v63 = vpop.xlane.xlu0 %196 }
 0x50d   : > { %v198_v0 = vrot.slane %v197_v63, 4 }
 0x50f   : > { %v199_v1 = vmax.f32 %v197_v63, %v198_v0 }
 0x511   : > { %v200_v2 = vrot.slane %v199_v1, 2 }
 0x513   : > { %v201_v3 = vmax.f32 %v199_v1, %v200_v2 }
 0x515   : > { %v202_v4 = vrot.slane %v201_v3, 1 }
 0x517   : > { %v203_v5 = vmax.f32 %v201_v3, %v202_v4 }
 0x519   : > { %301 = vpush %v203_v5 }
 0x54a   : > { %s302_s16 = spop %301 }
 0x54b   : > { %v205_v6 = vstv %s302_s16 }
 0x54c   : > { %vm206_vm12 = vcmp.eq.f32.partialorder %v195_v62, %v205_v6 }
 0x54d   : > { %v207_v7 = vsel %vm206_vm12, %v348_v13, 1073741824 }
 0x54e   : > { %v209_v8 = vshra.s32 %v207_v7, 16  ;;  %v208_v10 = vand.u32 65535, %v207_v7 }
 0x550   : > { %v211_v9 = vcvt.s32.f32 %v209_v8  ;;  %v210_v14 = vcvt.s32.f32 %v208_v10 }
 0x552   : > { %212 = vmin.xlane.f32.xlu1 %v211_v9 }
 0x5df   : > { %v213_v12 = vpop.xlane.xlu1 %212 }
 0x5e0   : > { %vm214_vm13 = vcmp.eq.f32.partialorder %v211_v9, %v213_v12  ;;  %v219_v16 = vcvt.f32.s32 %v213_v12 }
 0x5e1   : > { %v215_v15 = vsel %vm214_vm13, %v210_v14, inf }
 0x5e2   : > { %216 = vmin.xlane.f32.xlu0 %v215_v15  ;;  %v220_v18 = vshll.u32 %v219_v16, 16 }
 0x66f   : > { %v217_v17 = vpop.xlane.xlu0 %216 }
 0x670   : > { %v218_v19 = vcvt.f32.s32 %v217_v17 }
 0x672   : > { %v221_v20 = vadd.s32 %v220_v18, %v218_v19 }
 0x674   : > { %v222_v21 = vrot.slane %v221_v20, 4 }
 0x676   : > { %vm223_vm14 = vcmp.lt.s32.totalorder %v221_v20, %v222_v21 }
 0x677   : > { %v224_v22 = vsel %vm223_vm14, %v221_v20, %v222_v21 }
 0x678   : > { %v225_v13 = vrot.slane %v224_v22, 2 }
 0x67a   : > { %vm226_vm15 = vcmp.lt.s32.totalorder %v224_v22, %v225_v13 }
 0x67b   : > { %v227_v23 = vsel %vm226_vm15, %v224_v22, %v225_v13 }
 0x67c   : > { %v228_v24 = vrot.slane %v227_v23, 1 }
 0x67e   : > { %vm229_vm0 = vcmp.lt.s32.totalorder %v227_v23, %v228_v24 }
 0x67f   : > { %v230_v25 = vsel %vm229_vm0, %v227_v23, %v228_v24 }
 0x680   : > { %303 = vpush %v230_v25 }
 0x6b1   : > { %s304_s17 = spop %303 }
 0x6b2   : > { %v234_v26 = vstv %s304_s17 }
 0x6b3   : > { %v235_v27 = vsel %vm233_vm1, %v193_v61, %v234_v26 }
 0x6b4   : > { %v236_v28 = vsel %vm232_vm2, %v154_v33, %v235_v27 }
 0x6b5   : > { %237 = vst [vmem:[%s109_s20] sm:$0x1] %v236_v28 }
 0x6b6 PF: > { %s11_s6 = sadd.s32 1, %s319_s6  }
 0x6b7   : > { %p8_p4 = scmp.ge.s32.totalorder %s11_s6, 4  }
 0x6b9   :  { %10 = sbr.rel (!%p8_p4) target bundleno = 1 (0x1), region = 54 }

</bundles_post_ra>
